<compile_context>
chip_gen: v6e
topology: v6e:2x2x1
jax: 0.10.0
libtpu: 0.0.40
codegen_flags: <defaults>
</compile_context>

<pallas_src>
import functools
import math

import numpy as np
import jax
import jax.numpy as jnp
from jax.experimental import pallas as pl
from jax.experimental.pallas import tpu as pltpu

# ----------------------------------------------------------------------------
# Hyper-parameters (defaults of TensorProduct_protein_ScoreModel)
# ----------------------------------------------------------------------------
NS, NV = 16, 4
SIGMA_EMBED_DIM = 32
DISTANCE_EMBED_DIM = 32
LIG_MAX_RADIUS = 5.0
REC_MAX_RADIUS = 30.0
NUM_CONV_LAYERS = 2
TOR_SIGMA_MIN, TOR_SIGMA_MAX = 0.0314, 3.14

# rec_residue_feature_dims / rec_atom_feature_dims are external globals in the
# original code base; synthetic small categorical vocabularies are used here.
REC_RESIDUE_FEATURE_DIMS = ([21, 4], 0)
REC_ATOM_FEATURE_DIMS = ([12, 5], 0)

# irreps are lists of (multiplicity, l, parity)  -- use_second_order_repr=False
IRREP_SEQ = [
    [(NS, 0, 1)],
    [(NS, 0, 1), (NV, 1, -1)],
    [(NS, 0, 1), (NV, 1, -1), (NV, 1, 1)],
    [(NS, 0, 1), (NV, 1, -1), (NV, 1, 1), (NS, 0, -1)],
]
SH_IRREPS = [(1, 0, 1), (1, 1, -1), (1, 2, 1)]        # Irreps.spherical_harmonics(2)
TOR_SH_IRREPS = [(1, 0, 1), (1, 1, -1), (1, 1, 1)]    # used components of final_tp_tor out
TOR_OUT_IRREPS = [(NS, 0, -1), (NS, 0, 1)]            # '16x0o + 16x0e'

# TPU tiling constants
SLAB = 128            # lane-dense node-feature slab width
_EDGE_TILE = 512      # edges per tile (multiple of 128).  Kept at 512 so the v7x 64 MiB
                      # VMEM budget holds; on v6e/v5e (128 MiB) this may be raised to 1024.
_ROW_TILE = 512       # row tile for the small dense kernels


def _round_up(n, m):
    return ((n + m - 1) // m) * m


def _pick_tile(n, target):
    n = max(int(n), 1)
    if n <= target:
        return _round_up(n, 8)
    return target


def _to_slab(x, width=SLAB):
    return jnp.pad(x.astype(jnp.float32), ((0, 0), (0, width - x.shape[1])))


# ----------------------------------------------------------------------------
# Real Clebsch-Gordan (Wigner-3j-like) tensors in a Cartesian real basis.
# ----------------------------------------------------------------------------
def _build_cg():
    s2, s6 = 1.0 / np.sqrt(2.0), 1.0 / np.sqrt(6.0)
    M = np.zeros((5, 3, 3))
    M[0, 0, 1] = M[0, 1, 0] = s2            # ~ xy
    M[1, 1, 2] = M[1, 2, 1] = s2            # ~ yz
    M[2] = np.diag([-1.0, -1.0, 2.0]) * s6  # ~ 3z^2 - r^2
    M[3, 0, 2] = M[3, 2, 0] = s2            # ~ xz
    M[4] = np.diag([1.0, -1.0, 0.0]) * s2   # ~ x^2 - y^2
    eps = np.zeros((3, 3, 3))
    eps[0, 1, 2] = eps[1, 2, 0] = eps[2, 0, 1] = 1.0
    eps[0, 2, 1] = eps[2, 1, 0] = eps[1, 0, 2] = -1.0
    cg = {(0, 0, 0): np.ones((1, 1, 1))}
    for l in (1, 2):
        d = 2 * l + 1
        cg[(0, l, l)] = np.eye(d).reshape(1, d, d) / np.sqrt(d)
        cg[(l, 0, l)] = np.eye(d).reshape(d, 1, d) / np.sqrt(d)
        cg[(l, l, 0)] = np.eye(d).reshape(d, d, 1) / np.sqrt(d)
    cg[(1, 1, 1)] = eps / np.sqrt(6.0)
    cg[(1, 2, 1)] = np.transpose(M, (1, 0, 2)) / np.sqrt(5.0)   # C[i,a,j] = M[a,i,j]/sqrt5
    c221 = np.einsum('kij,ail,blj->abk', eps, M, M)
    cg[(2, 2, 1)] = c221 / np.linalg.norm(c221)
    return cg, M


CG, M_BASIS = _build_cg()


def spherical_harmonics_lmax2(vec):
    """Real spherical harmonics, normalize=True, normalization='component'.
    # TODO(synk): component ordering/signs follow the Cartesian basis M_BASIS (self-
    # consistent with the CG tensors) and may differ from e3nn's m-ordering convention.
    """
    n = jnp.linalg.norm(vec, axis=-1, keepdims=True)
    u = vec / jnp.maximum(n, 1e-12)
    sh0 = jnp.ones((vec.shape[0], 1), jnp.float32)
    sh1 = jnp.sqrt(3.0) * u
    uu = u[:, :, None] * u[:, None, :]
    sh2 = jnp.sqrt(7.5) * jnp.einsum('aij,eij->ea',
                                     jnp.asarray(M_BASIS, jnp.float32), uu)
    return jnp.concatenate([sh0, sh1, sh2], axis=-1).astype(jnp.float32)


def spherical_harmonics_l2(vec):
    return spherical_harmonics_lmax2(vec)[:, 4:9]


# ----------------------------------------------------------------------------
# FullyConnectedTensorProduct metadata (paths / weight layout / normalization)
# ----------------------------------------------------------------------------
def irreps_dim(irreps):
    return sum(mul * (2 * l + 1) for mul, l, _ in irreps)


def irreps_slices(irreps):
    out, off = [], 0
    for mul, l, p in irreps:
        out.append((off, mul, l, p))
        off += mul * (2 * l + 1)
    return out


def make_tp_metadata(in_irreps, sh_irreps, out_irreps):
    s1, s2, s3 = irreps_slices(in_irreps), irreps_slices(sh_irreps), irreps_slices(out_irreps)
    paths, woff = [], 0
    for i1, (o1, m1, l1, p1) in enumerate(s1):
        for (o2, _m2, l2, p2) in s2:
            for i3, (_o3, m3, l3, p3) in enumerate(s3):
                if p3 != p1 * p2 or l3 < abs(l1 - l2) or l3 > l1 + l2:
                    continue
                assert (l1, l2, l3) in CG
                cg = CG[(l1, l2, l3)]
                d1, d2, d3 = 2 * l1 + 1, 2 * l2 + 1, 2 * l3 + 1
                nz = [(a, b, o, float(cg[a, b, o]))
                      for a in range(d1) for b in range(d2) for o in range(d3)
                      if float(cg[a, b, o]) != 0.0]
                paths.append(dict(i3=i3, ib1=i1, o1=o1, m1=m1, l1=l1, o2=o2, l2=l2,
                                  m3=m3, l3=l3, woff=woff, wnum=m1 * m3, nz=nz))
                woff += m1 * m3
    fan = {}
    for p in paths:
        fan[p['i3']] = fan.get(p['i3'], 0) + p['m1']
    for p in paths:
        # TODO(synk): approximates e3nn irrep_normalization='component',
        # path_normalization='element' constants.
        p['alpha'] = math.sqrt((2 * p['l3'] + 1) / fan[p['i3']])
    out_blocks = [(m3, 2 * l3 + 1) for (_, m3, l3, _) in s3]
    out_dim = irreps_dim(out_irreps)
    # kernel-internal feature ordering per output block is (component-major, mul-minor);
    # perm maps e3nn position -> internal position, i.e. out_e3nn = out_internal[:, perm]
    perm = np.zeros((out_dim,), np.int32)
    off = 0
    for (m3, d3) in out_blocks:
        for o in range(d3):
            for u3 in range(m3):
                perm[off + u3 * d3 + o] = off + o * m3 + u3
        off += m3 * d3
    return dict(paths=paths, weight_numel=woff, out_blocks=out_blocks, out_dim=out_dim,
                in_slices=s1, in_dim=irreps_dim(in_irreps), perm=perm)


# ----------------------------------------------------------------------------
# Small dense Pallas kernels (Linear / MLP / fused GaussianSmearing+MLP)
# ----------------------------------------------------------------------------
_SMALL_PARAMS = pltpu.CompilerParams(dimension_semantics=("parallel",),
                                     vmem_limit_bytes=32 * 1024 * 1024)


def _linear_kernel(x_ref, w_ref, b_ref, o_ref):
    o_ref[...] = (jnp.dot(x_ref[...].astype(jnp.bfloat16), w_ref[...],
                          preferred_element_type=jnp.float32) + b_ref[...])


def pallas_linear(x, w, b):
    x = x.astype(jnp.float32)
    rows, din = x.shape
    dout = w.shape[1]
    tile = _pick_tile(rows, _ROW_TILE)
    r_pad = _round_up(rows, tile)
    xp = jnp.pad(x, ((0, r_pad - rows), (0, 0)))
    out = pl.pallas_call(
        _linear_kernel,
        grid=(r_pad // tile,),
        in_specs=[pl.BlockSpec((tile, din), lambda i: (i, 0)),
                  pl.BlockSpec((din, dout), lambda i: (0, 0)),
                  pl.BlockSpec((1, dout), lambda i: (0, 0))],
        out_specs=pl.BlockSpec((tile, dout), lambda i: (i, 0)),
        out_shape=jax.ShapeDtypeStruct((r_pad, dout), jnp.float32),
        compiler_params=_SMALL_PARAMS,
    )(xp, w.astype(jnp.bfloat16), b.reshape(1, -1).astype(jnp.float32))
    return out[:rows]


def _mlp2_kernel(x_ref, w1_ref, b1_ref, w2_ref, b2_ref, o_ref, *, act):
    h = jnp.dot(x_ref[...].astype(jnp.bfloat16), w1_ref[...],
                preferred_element_type=jnp.float32) + b1_ref[...]
    if act == 'relu':
        h = jnp.maximum(h, 0.0)
    elif act == 'tanh':
        h = jnp.tanh(h)
    o_ref[...] = jnp.dot(h.astype(jnp.bfloat16), w2_ref[...],
                         preferred_element_type=jnp.float32) + b2_ref[...]


def pallas_mlp2(x, w1, b1, w2, b2, act='relu'):
    x = x.astype(jnp.float32)
    rows, din = x.shape
    hid, dout = w1.shape[1], w2.shape[1]
    tile = _pick_tile(rows, _ROW_TILE)
    r_pad = _round_up(rows, tile)
    xp = jnp.pad(x, ((0, r_pad - rows), (0, 0)))
    out = pl.pallas_call(
        functools.partial(_mlp2_kernel, act=act),
        grid=(r_pad // tile,),
        in_specs=[pl.BlockSpec((tile, din), lambda i: (i, 0)),
                  pl.BlockSpec((din, hid), lambda i: (0, 0)),
                  pl.BlockSpec((1, hid), lambda i: (0, 0)),
                  pl.BlockSpec((hid, dout), lambda i: (0, 0)),
                  pl.BlockSpec((1, dout), lambda i: (0, 0))],
        out_specs=pl.BlockSpec((tile, dout), lambda i: (i, 0)),
        out_shape=jax.ShapeDtypeStruct((r_pad, dout), jnp.float32),
        compiler_params=_SMALL_PARAMS,
    )(xp, w1.astype(jnp.bfloat16), b1.reshape(1, -1).astype(jnp.float32),
      w2.astype(jnp.bfloat16), b2.reshape(1, -1).astype(jnp.float32))
    return out[:rows]


def _edge_embed_kernel(d_ref, sig_ref, off_ref, w1_ref, b1_ref, w2_ref, b2_ref, o_ref,
                       *, coeff):
    """GaussianSmearing fused with the 2-layer edge embedding MLP (sigma branch)."""
    diff = d_ref[...] - off_ref[...]
    g = jnp.exp(coeff * diff * diff)
    x = jnp.concatenate([sig_ref[...], g], axis=1)
    h = jnp.maximum(jnp.dot(x.astype(jnp.bfloat16), w1_ref[...],
                            preferred_element_type=jnp.float32) + b1_ref[...], 0.0)
    o_ref[...] = jnp.dot(h.astype(jnp.bfloat16), w2_ref[...],
                         preferred_element_type=jnp.float32) + b2_ref[...]


def _edge_embed_nosig_kernel(d_ref, off_ref, w1_ref, b1_ref, w2_ref, b2_ref, o_ref,
                             *, coeff):
    """GaussianSmearing fused with the 2-layer edge embedding MLP (no sigma branch)."""
    diff = d_ref[...] - off_ref[...]
    g = jnp.exp(coeff * diff * diff)
    h = jnp.maximum(jnp.dot(g.astype(jnp.bfloat16), w1_ref[...],
                            preferred_element_type=jnp.float32) + b1_ref[...], 0.0)
    o_ref[...] = jnp.dot(h.astype(jnp.bfloat16), w2_ref[...],
                         preferred_element_type=jnp.float32) + b2_ref[...]


def fused_edge_embedding(dist, sigma_emb, mlp, start, stop, num):
    """GaussianSmearing + edge-embedding MLP in a single row-tiled Pallas kernel."""
    offsets = np.linspace(start, stop, num).astype(np.float32)
    coeff = -0.5 / float(offsets[1] - offsets[0]) ** 2
    E = int(dist.shape[0])
    tile = _pick_tile(E, _ROW_TILE)
    e_pad = _round_up(E, tile)
    d = jnp.pad(dist.reshape(-1, 1).astype(jnp.float32), ((0, e_pad - E), (0, 0)))
    off = jnp.asarray(offsets).reshape(1, -1)
    w1 = mlp['w1'].astype(jnp.bfloat16)
    w2 = mlp['w2'].astype(jnp.bfloat16)
    b1 = mlp['b1'].reshape(1, -1).astype(jnp.float32)
    b2 = mlp['b2'].reshape(1, -1).astype(jnp.float32)
    hid, dout = mlp['w1'].shape[1], mlp['w2'].shape[1]
    if sigma_emb is not None:
        sig = jnp.pad(sigma_emb.astype(jnp.float32), ((0, e_pad - E), (0, 0)))
        ds = sig.shape[1]
        din = ds + num
        out = pl.pallas_call(
            functools.partial(_edge_embed_kernel, coeff=coeff),
            grid=(e_pad // tile,),
            in_specs=[pl.BlockSpec((tile, 1), lambda i: (i, 0)),
                      pl.BlockSpec((tile, ds), lambda i: (i, 0)),
                      pl.BlockSpec((1, num), lambda i: (0, 0)),
                      pl.BlockSpec((din, hid), lambda i: (0, 0)),
                      pl.BlockSpec((1, hid), lambda i: (0, 0)),
                      pl.BlockSpec((hid, dout), lambda i: (0, 0)),
                      pl.BlockSpec((1, dout), lambda i: (0, 0))],
            out_specs=pl.BlockSpec((tile, dout), lambda i: (i, 0)),
            out_shape=jax.ShapeDtypeStruct((e_pad, dout), jnp.float32),
            compiler_params=_SMALL_PARAMS,
        )(d, sig, off, w1, b1, w2, b2)
    else:
        out = pl.pallas_call(
            functools.partial(_edge_embed_nosig_kernel, coeff=coeff),
            grid=(e_pad // tile,),
            in_specs=[pl.BlockSpec((tile, 1), lambda i: (i, 0)),
                      pl.BlockSpec((1, num), lambda i: (0, 0)),
                      pl.BlockSpec((num, hid), lambda i: (0, 0)),
                      pl.BlockSpec((1, hid), lambda i: (0, 0)),
                      pl.BlockSpec((hid, dout), lambda i: (0, 0)),
                      pl.BlockSpec((1, dout), lambda i: (0, 0))],
            out_specs=pl.BlockSpec((tile, dout), lambda i: (i, 0)),
            out_shape=jax.ShapeDtypeStruct((e_pad, dout), jnp.float32),
            compiler_params=_SMALL_PARAMS,
        )(d, off, w1, b1, w2, b2)
    return out[:E]


# ----------------------------------------------------------------------------
# TensorProductConvLayer kernel: per-edge MLP -> tensor product -> scatter-add
# ----------------------------------------------------------------------------
def _tp_conv_kernel(bounds_ref, srcT_ref, shT_ref, eaT_ref,
                    w1T_ref, b1_ref, w2T_ref, b2_ref, *rest,
                    meta, n_xblocks, node_chunk, tiles_per_half):
    """One edge tile (edge axis on lanes everywhere):
       transposed FC MLP -> per-edge-weighted CG tensor product (lane-dense [m3, te]
       intermediates) -> node-chunked f32 scatter-add into the resident accumulator.
       Per-tile src ranges arrive via scalar prefetch; node chunks outside [lo, hi]
       are skipped (edges are pre-sorted by src, so 1-2 chunks survive per tile)."""
    x_refs = rest[:n_xblocks]
    o_ref = rest[n_xblocks]

    h_idx = pl.program_id(0)
    e_idx = pl.program_id(1)

    @pl.when(e_idx == 0)
    def _init():
        o_ref[...] = jnp.zeros_like(o_ref)

    te = srcT_ref.shape[0]
    f_pad, n_pad = o_ref.shape

    # ---- per-edge TP weights (transposed 2-layer MLP): wT[k, e], bf16 MXU, f32 acc ----
    hT = jnp.dot(w1T_ref[...], eaT_ref[...],
                 preferred_element_type=jnp.float32) + b1_ref[...]
    hT = jnp.maximum(hT, 0.0)
    wT = jnp.dot(w2T_ref[...], hT.astype(jnp.bfloat16),
                 preferred_element_type=jnp.float32) + b2_ref[...]          # [wnum, te]

    sh = shT_ref[...]                                                       # [16, te]
    sh_rows = [sh[i:i + 1, :] for i in range(9)]
    xblocks = [x_refs[i][...].astype(jnp.float32) for i in range(n_xblocks)]

    # per (output block, output component) contributions, each [m3, te]
    block_cols = [[None] * d3 for (_m3, d3) in meta['out_blocks']]
    for p in meta['paths']:
        m1, m3 = p['m1'], p['m3']
        xb = xblocks[p['ib1']]                                              # [d1, m1, te]
        wb3 = wT[p['woff']:p['woff'] + p['wnum'], :].reshape(m1, m3, te)    # aligned rows
        needed_a = sorted({a for (a, _b, _o, _c) in p['nz']})
        # t[a][u3, e] = sum_u1 w[u1,u3,e] * x[u1,a,e]  (u1-contraction hoisted out of
        # the CG-nonzero loop; every intermediate is lane-dense [m3, te]).
        t = {}
        for a in needed_a:
            xa = xb[a]                                                      # [m1, te]
            acc = None
            for u1 in range(m1):
                term = wb3[u1] * xa[u1:u1 + 1, :]
                acc = term if acc is None else acc + term
            t[a] = acc
        for (a, b, o, c) in p['nz']:
            contrib = (p['alpha'] * c) * (t[a] * sh_rows[p['o2'] + b])
            prev = block_cols[p['i3']][o]
            block_cols[p['i3']][o] = contrib if prev is None else prev + contrib

    # assemble tpT [f_pad, te] in kernel-internal feature order (JAX glue permutes back)
    rows = []
    for i3, (m3, d3) in enumerate(meta['out_blocks']):
        for o in range(d3):
            v = block_cols[i3][o]
            rows.append(v if v is not None else jnp.zeros((m3, te), jnp.float32))
    if f_pad > meta['out_dim']:
        rows.append(jnp.zeros((f_pad - meta['out_dim'], te), jnp.float32))
    tpT = jnp.concatenate(rows, axis=0)                                     # [f_pad, te]

    # ---- node-chunked scatter-add (f32: no bf16 truncation of the TP output) ----
    srcT = srcT_ref[...]                                                    # [te, 1] int32
    t_glob = h_idx * tiles_per_half + e_idx
    lo = bounds_ref[0, t_glob]
    hi = bounds_ref[1, t_glob]
    n_chunks = n_pad // node_chunk

    def scatter_chunk(cs):
        col = jax.lax.broadcasted_iota(jnp.int32, (te, node_chunk), 1) + cs
        onehotT = jnp.where(srcT == col, 1.0, 0.0)                          # [te, chunk]
        upd = jnp.dot(tpT, onehotT, preferred_element_type=jnp.float32)     # [f_pad, chunk]
        o_ref[:, cs:cs + node_chunk] += upd

    for c in range(n_chunks):                       # static loop; skipped chunks are a
        cs = c * node_chunk                         # cheap branch (edges src-sorted)
        pl.when(jnp.logical_and(hi >= cs, lo < cs + node_chunk))(
            functools.partial(scatter_chunk, cs))


def tp_conv_layer(layer_params, meta, out_irreps, node_attr, edge_index, edge_attr,
                  edge_sh, out_nodes, batch_norm=True):
    """node_attr / returned updates are [rows, SLAB] lane-dense slabs."""
    edge_src = edge_index[0].astype(jnp.int32)
    edge_dst = edge_index[1].astype(jnp.int32)
    E = int(edge_index.shape[1])
    n = int(out_nodes)
    in_dim, out_dim = meta['in_dim'], meta['out_dim']

    # sort edges by scatter destination so each edge tile touches a narrow node range
    order = jnp.argsort(edge_src)
    src_s = edge_src[order]
    dst_s = edge_dst[order]
    ea_s = jnp.take(edge_attr.astype(jnp.float32), order, axis=0)
    sh_s = jnp.take(edge_sh.astype(jnp.float32), order, axis=0)
    # TODO(synk): this row gather stays in JAX; an in-kernel gather via prefetched
    # edge_dst indices + manual DMA would remove the [E, in_dim] HBM round trip.
    x_g = jnp.take(node_attr[:, :in_dim], dst_s, axis=0)

    tile_e = min(_EDGE_TILE, _round_up(max(E, 1), 128))
    e_pad = _round_up(max(E, 1), 2 * tile_e)          # 2 halves -> megacore 'parallel' axis
    tiles_per_half = e_pad // (2 * tile_e)
    tiles_total = 2 * tiles_per_half

    n_pad = _round_up(n, 128)
    f_pad = _round_up(out_dim, 8)
    if n_pad <= 512:
        node_chunk = n_pad
    elif n_pad % 512 == 0:
        node_chunk = 512
    elif n_pad % 256 == 0:
        node_chunk = 256
    else:
        node_chunk = 128

    # --- transposed operands: the edge axis goes on TPU lanes ---
    eaT = jnp.pad(ea_s, ((0, e_pad - E), (0, 0))).T.astype(jnp.bfloat16)    # [din, e_pad]
    shT = jnp.pad(sh_s, ((0, e_pad - E), (0, 16 - sh_s.shape[1]))).T        # [16, e_pad]
    src_pad = jnp.pad(src_s, (0, e_pad - E), constant_values=-1)
    srcT = src_pad.reshape(e_pad, 1)
    src_tiles = src_pad.reshape(tiles_total, tile_e)
    bounds = jnp.stack([jnp.min(src_tiles, axis=1),
                        jnp.max(src_tiles, axis=1)], axis=0).astype(jnp.int32)

    idx_e3 = lambda h, e, bnd: (0, 0, h * tiles_per_half + e)
    idx_e2 = lambda h, e, bnd: (0, h * tiles_per_half + e)
    idx_src = lambda h, e, bnd: (h * tiles_per_half + e, 0)
    idx_full = lambda h, e, bnd: (0, 0)

    xblocks, xspecs = [], []
    for (o1, m1, l1, _p1) in meta['in_slices']:
        d1 = 2 * l1 + 1
        blk = x_g[:, o1:o1 + m1 * d1].reshape(E, m1, d1)
        blk = jnp.pad(jnp.transpose(blk, (2, 1, 0)), ((0, 0), (0, 0), (0, e_pad - E)))
        xblocks.append(blk.astype(jnp.float32))                             # [d1, m1, e_pad]
        xspecs.append(pl.BlockSpec((d1, m1, tile_e), idx_e3))

    din = eaT.shape[0]
    hid = layer_params['w1'].shape[1]
    wnum = layer_params['w2'].shape[1]
    w1T = layer_params['w1'].T.astype(jnp.bfloat16)
    w2T = layer_params['w2'].T.astype(jnp.bfloat16)
    b1c = layer_params['b1'].reshape(-1, 1).astype(jnp.float32)
    b2c = layer_params['b2'].reshape(-1, 1).astype(jnp.float32)

    in_specs = [pl.BlockSpec((tile_e, 1), idx_src),            # edge src (sorted, pad=-1)
                pl.BlockSpec((16, tile_e), idx_e2),            # spherical harmonics^T
                pl.BlockSpec((din, tile_e), idx_e2),           # edge attrs^T (bf16)
                pl.BlockSpec((hid, din), idx_full),            # fc w1^T
                pl.BlockSpec((hid, 1), idx_full),
                pl.BlockSpec((wnum, hid), idx_full),           # fc w2^T
                pl.BlockSpec((wnum, 1), idx_full)] + xspecs

    acc_bytes = 4 * f_pad * n_pad
    flops = int(e_pad * 2 * (din * hid + hid * wnum) + e_pad * 8 * wnum
                + tiles_total * 2 * f_pad * tile_e * node_chunk)
    bytes_accessed = int(eaT.size * 2 + shT.size * 4 + srcT.size * 4
                         + sum(b.size for b in xblocks) * 4
                         + (w1T.size + w2T.size) * 2 + 2 * acc_bytes)

    out2 = pl.pallas_call(
        functools.partial(_tp_conv_kernel, meta=meta, n_xblocks=len(xblocks),
                          node_chunk=node_chunk, tiles_per_half=tiles_per_half),
        grid_spec=pltpu.PrefetchScalarGridSpec(
            num_scalar_prefetch=1,
            grid=(2, tiles_per_half),
            in_specs=in_specs,
            out_specs=pl.BlockSpec((None, f_pad, n_pad), lambda h, e, bnd: (h, 0, 0)),
        ),
        out_shape=jax.ShapeDtypeStruct((2, f_pad, n_pad), jnp.float32),
        compiler_params=pltpu.CompilerParams(
            dimension_semantics=("parallel", "arbitrary"),      # edge halves // reduction
            vmem_limit_bytes=int(min(40 * 2 ** 20, 24 * 2 ** 20 + 2 * acc_bytes))),
        cost_estimate=pl.CostEstimate(flops=flops, transcendentals=0,
                                      bytes_accessed=bytes_accessed),
    )(bounds, srcT, shT, eaT, w1T, b1c, w2T, b2c, *xblocks)

    acc = out2[0] + out2[1]                                     # combine the two halves
    counts = jnp.bincount(edge_src, length=n).astype(jnp.float32)
    inv = 1.0 / jnp.maximum(counts, 1.0)                        # scatter reduce='mean'
    node_out = acc.T[:n, :out_dim]
    node_out = node_out[:, jnp.asarray(meta['perm'])] * inv[:, None]
    if batch_norm:
        # TODO(synk): batch norm kept in JAX glue; could be fused into a finalize kernel.
        node_out = e3nn_batch_norm(node_out, out_irreps)
    return jnp.pad(node_out, ((0, 0), (0, SLAB - out_dim)))     # [out_nodes, SLAB]


# ----------------------------------------------------------------------------
# e3nn-style BatchNorm (training-mode batch statistics, affine = identity at init)
# ----------------------------------------------------------------------------
def e3nn_batch_norm(x, irreps, eps=1e-5):
    # TODO(synk): running-statistics / momentum bookkeeping of e3nn BatchNorm not modeled.
    blocks, off = [], 0
    for mul, l, p in irreps:
        d = 2 * l + 1
        field = x[:, off:off + mul * d].reshape(-1, mul, d)
        if l == 0 and p == 1:
            field = field - jnp.mean(field, axis=0, keepdims=True)
        norm = jnp.mean(jnp.mean(field * field, axis=2), axis=0)
        field = field * ((norm + eps) ** -0.5)[None, :, None]
        blocks.append(field.reshape(-1, mul * d))
        off += mul * d
    return jnp.concatenate(blocks, axis=1)


# ----------------------------------------------------------------------------
# Module pieces
# ----------------------------------------------------------------------------
def init_linear(key, din, dout, bias=True):
    k1, k2 = jax.random.split(key)
    bound = 1.0 / math.sqrt(din)
    w = jax.random.uniform(k1, (din, dout), jnp.float32, -bound, bound)
    b = (jax.random.uniform(k2, (dout,), jnp.float32, -bound, bound)
         if bias else jnp.zeros((dout,), jnp.float32))
    return w, b


def init_mlp(key, din, dh, dout):
    k1, k2 = jax.random.split(key)
    w1, b1 = init_linear(k1, din, dh)
    w2, b2 = init_linear(k2, dh, dout)
    return dict(w1=w1, b1=b1, w2=w2, b2=b2)


def init_atom_encoder(key, feature_dims, emb_dim, sigma_embed_dim):
    keys = jax.random.split(key, len(feature_dims[0]) + 1)
    tables = []
    for i, dim in enumerate(feature_dims[0]):
        scale = math.sqrt(6.0 / (dim + emb_dim))   # xavier uniform
        tables.append(jax.random.uniform(keys[i], (dim, emb_dim), jnp.float32, -scale, scale))
    num_scalar = feature_dims[1] + sigma_embed_dim
    w, b = init_linear(keys[-1], num_scalar, emb_dim)
    return dict(tables=tables, w=w, b=b, n_cat=len(feature_dims[0]), n_scalar=num_scalar)


def atom_encoder_forward(params, x):
    assert x.shape[1] == params['n_cat'] + params['n_scalar']
    emb = jnp.zeros((x.shape[0], params['w'].shape[1]), jnp.float32)
    for i, table in enumerate(params['tables']):
        idx = x[:, i].astype(jnp.int32)
        emb = emb + jnp.take(table, idx, axis=0)
    scalars = x[:, params['n_cat']:params['n_cat'] + params['n_scalar']].astype(jnp.float32)
    return emb + pallas_linear(scalars, params['w'], params['b'])


def timestep_emb_func(t, dim=SIGMA_EMBED_DIM, max_positions=10000):
    t = t * 10000.0
    half = dim // 2
    freqs = jnp.exp(-math.log(max_positions) *
                    jnp.arange(half, dtype=jnp.float32) / (half - 1))
    args = t[:, None] * freqs[None, :]
    return jnp.concatenate([jnp.sin(args), jnp.cos(args)], axis=-1)


def t_to_sigma(t):
    return TOR_SIGMA_MIN ** (1.0 - t) * TOR_SIGMA_MAX ** t


def torus_score_norm(sigma):
    # TODO(synk): analytic surrogate for the precomputed torus.score_norm lookup table.
    return 1.0 / (sigma * sigma + 1e-3)


def init_model(key):
    keys = iter(jax.random.split(key, 64))
    params = {}
    params['rec_node_embedding'] = init_atom_encoder(next(keys), REC_RESIDUE_FEATURE_DIMS,
                                                     NS, SIGMA_EMBED_DIM)
    params['atom_node_embedding'] = init_atom_encoder(next(keys), REC_ATOM_FEATURE_DIMS,
                                                      NS, SIGMA_EMBED_DIM)
    params['rec_edge_embedding'] = init_mlp(next(keys), SIGMA_EMBED_DIM + DISTANCE_EMBED_DIM, NS, NS)
    params['atom_edge_embedding'] = init_mlp(next(keys), SIGMA_EMBED_DIM + DISTANCE_EMBED_DIM, NS, NS)
    params['ar_edge_embedding'] = init_mlp(next(keys), SIGMA_EMBED_DIM + DISTANCE_EMBED_DIM, NS, NS)
    params['side_edge_embedding'] = init_mlp(next(keys), DISTANCE_EMBED_DIM, NS, NS)

    conv_layers, conv_metas = [], []
    for i in range(NUM_CONV_LAYERS):
        in_irreps = IRREP_SEQ[min(i, len(IRREP_SEQ) - 1)]
        out_irreps = IRREP_SEQ[min(i + 1, len(IRREP_SEQ) - 1)]
        meta = make_tp_metadata(in_irreps, SH_IRREPS, out_irreps)
        for _ in range(4):
            conv_layers.append(init_mlp(next(keys), 3 * NS, 3 * NS, meta['weight_numel']))
            conv_metas.append((meta, out_irreps))
    params['conv_layers'] = conv_layers
    params['conv_metas'] = conv_metas

    tor_in = IRREP_SEQ[min(NUM_CONV_LAYERS, len(IRREP_SEQ) - 1)]
    tor_meta = make_tp_metadata(tor_in, TOR_SH_IRREPS, TOR_OUT_IRREPS)
    params['tor_bond_conv'] = init_mlp(next(keys), 3 * NS, 3 * NS, tor_meta['weight_numel'])
    params['tor_meta'] = (tor_meta, TOR_OUT_IRREPS)

    w1, _ = init_linear(next(keys), 2 * NS, NS, bias=False)
    w2, _ = init_linear(next(keys), NS, 1, bias=False)
    params['tor_final'] = dict(w1=w1, b1=jnp.zeros((NS,), jnp.float32),
                               w2=w2, b2=jnp.zeros((1,), jnp.float32))
    return params


# ----------------------------------------------------------------------------
# Forward pass (mirrors TensorProduct_protein_ScoreModel.forward)
# ----------------------------------------------------------------------------
def forward(params, data):
    ns = NS
    tor_sigma = t_to_sigma(data['complex_t'])                        # [num_graphs]

    # ---------- build_rec_conv_graph ----------
    rec_sigma_emb = timestep_emb_func(data['rec_node_t'])
    rec_node_attr = jnp.concatenate([data['rec_x'].astype(jnp.float32), rec_sigma_emb], 1)
    rec_ei = data['rec_edge_index']
    rec_vec = data['rec_pos'][rec_ei[1]] - data['rec_pos'][rec_ei[0]]
    rec_edge_sh = spherical_harmonics_lmax2(rec_vec)

    rec_node_attr = _to_slab(atom_encoder_forward(params['rec_node_embedding'], rec_node_attr))
    rec_edge_attr = fused_edge_embedding(jnp.linalg.norm(rec_vec, axis=-1),
                                         rec_sigma_emb[rec_ei[0]],
                                         params['rec_edge_embedding'],
                                         0.0, REC_MAX_RADIUS, DISTANCE_EMBED_DIM)

    # ---------- build_atom_conv_graph ----------
    # TODO(synk): radius_graph + torch.unique edge construction is dynamic-shape data
    # prep; a fixed synthetic union edge set is supplied in `data` instead.
    atom_sigma_emb = timestep_emb_func(data['atom_node_t'])
    atom_node_attr = jnp.concatenate([data['atom_x'].astype(jnp.float32), atom_sigma_emb], 1)
    atom_ei = data['atom_edge_index']
    atom_pos = data['atom_pos']
    atom_vec = atom_pos[atom_ei[1]] - atom_pos[atom_ei[0]]
    atom_edge_sh = spherical_harmonics_lmax2(atom_vec)

    atom_node_attr = _to_slab(atom_encoder_forward(params['atom_node_embedding'], atom_node_attr))
    atom_edge_attr = fused_edge_embedding(jnp.linalg.norm(atom_vec, axis=-1),
                                          atom_sigma_emb[atom_ei[0]],
                                          params['atom_edge_embedding'],
                                          0.0, LIG_MAX_RADIUS, DISTANCE_EMBED_DIM)

    # ---------- build_cross_conv_graph ----------
    ar_ei = data['ar_edge_index']
    ar_vec = data['rec_pos'][ar_ei[1]] - atom_pos[ar_ei[0]]
    ar_edge_sh = spherical_harmonics_lmax2(ar_vec)
    ar_edge_attr = fused_edge_embedding(jnp.linalg.norm(ar_vec, axis=-1),
                                        atom_sigma_emb[ar_ei[0]],
                                        params['ar_edge_embedding'],
                                        0.0, REC_MAX_RADIUS, DISTANCE_EMBED_DIM)

    n_atom = atom_node_attr.shape[0]
    n_rec = rec_node_attr.shape[0]

    # ---------- interaction layers (node attrs are [N, 128] lane-dense slabs) ----------
    for l in range(NUM_CONV_LAYERS):
        meta, out_irreps = params['conv_metas'][4 * l]
        atom_edge_attr_ = jnp.concatenate(
            [atom_edge_attr, atom_node_attr[atom_ei[0], :ns], atom_node_attr[atom_ei[1], :ns]], -1)
        atom_update = tp_conv_layer(params['conv_layers'][4 * l], meta, out_irreps,
                                    atom_node_attr, atom_ei, atom_edge_attr_, atom_edge_sh,
                                    out_nodes=n_atom)

        meta, out_irreps = params['conv_metas'][4 * l + 1]
        ar_edge_attr_ = jnp.concatenate(
            [ar_edge_attr, atom_node_attr[ar_ei[0], :ns], rec_node_attr[ar_ei[1], :ns]], -1)
        ar_update = tp_conv_layer(params['conv_layers'][4 * l + 1], meta, out_irreps,
                                  rec_node_attr, ar_ei, ar_edge_attr_, ar_edge_sh,
                                  out_nodes=n_atom)

        if l != NUM_CONV_LAYERS - 1:
            meta, out_irreps = params['conv_metas'][4 * l + 2]
            rec_edge_attr_ = jnp.concatenate(
                [rec_edge_attr, rec_node_attr[rec_ei[0], :ns], rec_node_attr[rec_ei[1], :ns]], -1)
            rec_update = tp_conv_layer(params['conv_layers'][4 * l + 2], meta, out_irreps,
                                       rec_node_attr, rec_ei, rec_edge_attr_, rec_edge_sh,
                                       out_nodes=n_rec)

            meta, out_irreps = params['conv_metas'][4 * l + 3]
            ra_edge_attr_ = jnp.concatenate(
                [ar_edge_attr, rec_node_attr[ar_ei[1], :ns], atom_node_attr[ar_ei[0], :ns]], -1)
            ra_ei = ar_ei[::-1]                                      # torch.flip(dims=[0])
            ra_update = tp_conv_layer(params['conv_layers'][4 * l + 3], meta, out_irreps,
                                      atom_node_attr, ra_ei, ra_edge_attr_, ar_edge_sh,
                                      out_nodes=n_rec)

        # residual add in the zero-padded 128-wide slab space == F.pad(...) + add
        atom_node_attr = atom_node_attr + atom_update + ar_update
        if l != NUM_CONV_LAYERS - 1:
            rec_node_attr = rec_node_attr + rec_update + ra_update

    # ---------- torsion head ----------
    contact_ei = data['atom_contact_edge_index']
    tor_mask = data['tor_mask']                                      # host-side numpy bool
    tor_ids = np.nonzero(tor_mask)[0]
    bonds = contact_ei[:, tor_ids]                                   # [2, n_tor]
    bond_pos = (atom_pos[bonds[0]] + atom_pos[bonds[1]]) / 2.0
    # TODO(synk): torch_cluster.radius(bond_pos, atom_pos) neighbour search is dynamic-
    # shape data prep; a fixed synthetic assignment is supplied in `data` instead.
    tor_ei = data['tor_edge_index']                                  # row0 -> bond, row1 -> atom
    tor_vec = atom_pos[tor_ei[1]] - bond_pos[tor_ei[0]]
    tor_edge_attr = fused_edge_embedding(jnp.linalg.norm(tor_vec, axis=-1), None,
                                         params['side_edge_embedding'],
                                         0.0, LIG_MAX_RADIUS, DISTANCE_EMBED_DIM)
    tor_edge_sh = spherical_harmonics_lmax2(tor_vec)

    tor_bond_vec = atom_pos[bonds[1]] - atom_pos[bonds[0]]
    tor_bond_attr = atom_node_attr[bonds[0]] + atom_node_attr[bonds[1]]
    tor_bonds_sh = spherical_harmonics_l2(tor_bond_vec)              # '2e'
    b2 = tor_bonds_sh[tor_ei[0]]

    # final_tp_tor = o3.FullTensorProduct(sh_irreps, '2e'); only the 0e/1o/1e outputs can
    # couple into the '16x0o + 16x0e' tor_bond_conv output.
    sh1 = tor_edge_sh[:, 1:4]
    sh2 = tor_edge_sh[:, 4:9]
    out0e = math.sqrt(1.0) * jnp.einsum('ea,eb,abk->ek', sh2, b2,
                                        jnp.asarray(CG[(2, 2, 0)], jnp.float32))
    out1o = math.sqrt(3.0) * jnp.einsum('ei,ea,iaj->ej', sh1, b2,
                                        jnp.asarray(CG[(1, 2, 1)], jnp.float32))
    out1e = math.sqrt(3.0) * jnp.einsum('ea,eb,abk->ek', sh2, b2,
                                        jnp.asarray(CG[(2, 2, 1)], jnp.float32))
    tor_edge_sh_tp = jnp.concatenate([out0e, out1o, out1e], axis=1)
    # TODO(synk): remaining FullTensorProduct output irreps (2e/2o/3o/3e/4e) omitted —
    # no FullyConnectedTensorProduct path from them reaches the scalar outputs.

    tor_edge_attr = jnp.concatenate(
        [tor_edge_attr, atom_node_attr[tor_ei[1], :ns], tor_bond_attr[tor_ei[0], :ns]], -1)

    n_tor = int(tor_mask.sum())
    tor_meta, tor_out_irreps = params['tor_meta']
    tor_pred = tp_conv_layer(params['tor_bond_conv'], tor_meta, tor_out_irreps,
                             atom_node_attr, tor_ei, tor_edge_attr, tor_edge_sh_tp,
                             out_nodes=n_tor)
    tor_pred = pallas_mlp2(tor_pred[:, :2 * ns],
                           params['tor_final']['w1'], params['tor_final']['b1'],
                           params['tor_final']['w2'], params['tor_final']['b2'],
                           act='tanh')
    tor_pred = tor_pred[:, 0]

    edge_sigma = tor_sigma[data['atom_batch']][contact_ei[0]][tor_ids]
    tor_pred = tor_pred * jnp.sqrt(torus_score_norm(edge_sigma))
    return tor_pred


# ----------------------------------------------------------------------------
# Main: synthetic deterministic inputs
# ----------------------------------------------------------------------------
if __name__ == "__main__":
    key = jax.random.PRNGKey(0)
    ks = jax.random.split(key, 16)

    n_atom, n_rec, num_graphs = 16, 8, 2
    E_atom, E_rec, E_ar, E_contact, E_tor = 24, 16, 20, 12, 16

    atom_batch = jnp.repeat(jnp.arange(num_graphs, dtype=jnp.int32), n_atom // num_graphs)
    rec_batch = jnp.repeat(jnp.arange(num_graphs, dtype=jnp.int32), n_rec // num_graphs)
    complex_t = jnp.array([0.3, 0.7], jnp.float32)

    atom_pos = 3.0 * jax.random.normal(ks[0], (n_atom, 3), jnp.float32)
    rec_pos = 5.0 * jax.random.normal(ks[1], (n_rec, 3), jnp.float32)

    atom_x = jnp.stack(
        [jax.random.randint(ks[2], (n_atom,), 0, REC_ATOM_FEATURE_DIMS[0][0]),
         jax.random.randint(ks[3], (n_atom,), 0, REC_ATOM_FEATURE_DIMS[0][1])], 1
    ).astype(jnp.float32)
    rec_x = jnp.stack(
        [jax.random.randint(ks[4], (n_rec,), 0, REC_RESIDUE_FEATURE_DIMS[0][0]),
         jax.random.randint(ks[5], (n_rec,), 0, REC_RESIDUE_FEATURE_DIMS[0][1])], 1
    ).astype(jnp.float32)

    def rand_edges(k, E, n_src, n_dst, no_self=True):
        k1, k2 = jax.random.split(k)
        src = jax.random.randint(k1, (E,), 0, n_src)
        dst = jax.random.randint(k2, (E,), 0, n_dst)
        if no_self:
            dst = jnp.where(dst == src, (dst + 1) % n_dst, dst)
        return jnp.stack([src, dst]).astype(jnp.int32)

    rec_edge_index = rand_edges(ks[6], E_rec, n_rec, n_rec)
    atom_edge_index = rand_edges(ks[7], E_atom, n_atom, n_atom)
    atom_contact_edge_index = rand_edges(ks[8], E_contact, n_atom, n_atom)
    ar_edge_index = rand_edges(ks[9], E_ar, n_atom, n_rec, no_self=False)

    tor_mask = np.zeros((E_contact,), dtype=bool)
    tor_mask[[1, 4, 7, 10]] = True
    n_tor = int(tor_mask.sum())
    tor_edge_index = jnp.stack(
        [jax.random.randint(ks[10], (E_tor,), 0, n_tor),
         jax.random.randint(ks[11], (E_tor,), 0, n_atom)]).astype(jnp.int32)

    data = dict(
        complex_t=complex_t,
        atom_pos=atom_pos, rec_pos=rec_pos,
        atom_x=atom_x, rec_x=rec_x,
        atom_batch=atom_batch, rec_batch=rec_batch,
        atom_node_t=complex_t[atom_batch], rec_node_t=complex_t[rec_batch],
        rec_edge_index=rec_edge_index,
        atom_edge_index=atom_edge_index,
        atom_contact_edge_index=atom_contact_edge_index,
        ar_edge_index=ar_edge_index,
        tor_mask=tor_mask,
        tor_edge_index=tor_edge_index,
    )

    params = init_model(jax.random.PRNGKey(0))
    tor_pred = forward(params, data)
    tor_pred = jax.block_until_ready(tor_pred)
    assert tor_pred.shape == (n_tor,)
    assert bool(jnp.all(jnp.isfinite(tor_pred)))
    print("KERNEL_OK")
</pallas_src>

<mosaic_0001>
module attributes {stable_mosaic.version = 11 : i64} {
  func.func @_linear_kernel(%arg0: i32, %arg1: memref<8x32xf32, #tpu.memory_space<vmem>>, %arg2: memref<32x16xbf16, #tpu.memory_space<vmem>>, %arg3: memref<1x16xf32, #tpu.memory_space<vmem>>, %arg4: memref<8x16xf32, #tpu.memory_space<vmem>>) attributes {dimension_semantics = [#tpu.dimension_semantics<parallel>], iteration_bounds = array<i64: 1>, scalar_prefetch = 0 : i64, scratch_operands = 0 : i64, tpu.core_type = #tpu.core_type<tc>, window_params = [{transform_indices = @transform_0, window_bounds = array<i64: 8, 32>}, {pipeline_mode = #tpu.pipeline_mode<synchronous>, transform_indices = @transform_1, window_bounds = array<i64: 32, 16>}, {pipeline_mode = #tpu.pipeline_mode<synchronous>, transform_indices = @transform_2, window_bounds = array<i64: 1, 16>}, {transform_indices = @transform_3, window_bounds = array<i64: 8, 16>}]} {
    %c0 = arith.constant 0 : index
    %c0_0 = arith.constant 0 : index
    %0 = vector.load %arg1[%c0, %c0_0] : memref<8x32xf32, #tpu.memory_space<vmem>>, vector<8x32xf32>
    %1 = arith.truncf %0 : vector<8x32xf32> to vector<8x32xbf16>
    %c0_1 = arith.constant 0 : index
    %c0_2 = arith.constant 0 : index
    %2 = vector.load %arg2[%c0_1, %c0_2] : memref<32x16xbf16, #tpu.memory_space<vmem>>, vector<32x16xbf16>
    %cst = arith.constant dense<0.000000e+00> : vector<8x16xf32>
    %3 = tpu.matmul %1, %2, %cst {dimension_numbers = #tpu.dot_dimension_numbers<[1], [0], [0], [1], [0, 0, 1, 1], [], []>} : vector<8x32xbf16>, vector<32x16xbf16>, vector<8x16xf32> -> vector<8x16xf32>
    %c0_3 = arith.constant 0 : index
    %c0_4 = arith.constant 0 : index
    %4 = vector.load %arg3[%c0_3, %c0_4] : memref<1x16xf32, #tpu.memory_space<vmem>>, vector<1x16xf32>
    %5 = vector.broadcast %4 : vector<1x16xf32> to vector<8x16xf32>
    %6 = arith.addf %3, %5 : vector<8x16xf32>
    %c0_5 = arith.constant 0 : index
    %c0_6 = arith.constant 0 : index
    %7 = vector.load %arg4[%c0_5, %c0_6] : memref<8x16xf32, #tpu.memory_space<vmem>>, vector<8x16xf32>
    tpu.vector_store %arg4[%c0_5, %c0_6], %6 {strides = array<i32>} : memref<8x16xf32, #tpu.memory_space<vmem>>, vector<8x16xf32>,
    return
  }
  func.func @transform_0(%arg0: i32) -> (i32, i32) {
    %c0_i32 = arith.constant 0 : i32
    %c0_i32_0 = arith.constant 0 : i32
    return %arg0, %c0_i32 : i32, i32
  }
  func.func @transform_1(%arg0: i32) -> (i32, i32) {
    %c0_i32 = arith.constant 0 : i32
    %c0_i32_0 = arith.constant 0 : i32
    %c0_i32_1 = arith.constant 0 : i32
    return %c0_i32, %c0_i32_0 : i32, i32
  }
  func.func @transform_2(%arg0: i32) -> (i32, i32) {
    %c0_i32 = arith.constant 0 : i32
    %c0_i32_0 = arith.constant 0 : i32
    %c0_i32_1 = arith.constant 0 : i32
    return %c0_i32, %c0_i32_0 : i32, i32
  }
  func.func @transform_3(%arg0: i32) -> (i32, i32) {
    %c0_i32 = arith.constant 0 : i32
    %c0_i32_0 = arith.constant 0 : i32
    return %arg0, %c0_i32 : i32, i32
  }
}

</mosaic_0001>

<bundles_post_ra>
// kernel: tpu_custom_call.1
= control target key start
LH: loop header
LB: loop body
LE: loop exit
PB: predicated region body
PF: predicated region fallthrough
CT: control target
= control target key end

     0   :  { %v143_v1 = vmov 0.0   ;;  %vm144_vm0 = vmmov 0   ;;  %s181_s0 = inlined_call_operand.vmem [shape: f32[8,32], index: 0, kind: input, shape index: {}]   ;;  %s182_s1 = inlined_call_operand.vmem [shape: bf16[32,16], index: 1, kind: input, shape index: {}]   ;;  %s183_s2 = inlined_call_operand.vmem [shape: f32[1,16], index: 2, kind: input, shape index: {}]   ;;  %s184_s3 = inlined_call_operand.hbm [shape: f32[8,16], index: 3, kind: output, shape index: {}]  }
   0x1   :  { %v119_v0 = vld [vmem:[%s182_s1 + $0x8] sm:$0xff]   ;;  %108 = vmatprep.subr.bf16.mxu0 %v143_v1  ;;  %v120_v2 = vld [vmem:[%s182_s1] sm:$0xff]   ;;  %112 = vmatprep.mubr.msk.bf16.mxu0 %vm144_vm0, %v143_v1 }
   0x2   :  { %109 = vmatpush3.bf16.msra.mxu0 %v119_v0  ;;  %v16_v3 = vld [vmem:[%s181_s0] sm:$0xff] }
   0x3   :  { %8 = vsyncpa [#allocation3], 0  ;;  %110 = vmatprep.subr.bf16.mxu0 %v143_v1  ;;  %v17_v4 = vpack.c.bf16 %v16_v3, %v16_v3  ;;  %vm41_vm1 = vcmask 261120   ;;  %v101_v5 = vld [vmem:[%s183_s2] ss:$0 sm:$0xff]  ;;  %s145_s20 = smov [#allocation2]  }
   0x4   :  { %s93_s21 = sshll.u32 %s145_s20, 4  ;;  %vm85_vm2 = vcmask 130048   ;;  %s94_s21 = int_to_ptr.vmem [resolvable:$true] %s93_s21 }
   0x5   :  { %s121_s0 = scalar_lea.vmem %s94_s21, 128  ;;  %p126_p1 = scmp.lt.s32.totalorder %s94_s21, %s94_s21 }
   0x6   :  { %111 = vmatpush3.bf16.msra.mxu0 %v120_v2  ;;  %p122_p0 = scmp.ne.s32.totalorder %s94_s21, %s121_s0  ;;  %p127_p2 = scmp.lt.s32.totalorder %s121_s0, %s121_s0 }
   0x8   :  { %p128_p3 = por %p127_p2, %p126_p1 }
   0x9   :  { %113 = vmatmul.mubr.msk.bf16.vlgmr.msra.gmra.mxu0 %vm41_vm1, %v17_v4 }
   0xa   :  { %p129_p4 = pnand %p128_p3, %p122_p0 }
  0xc9   :  { %v79_v6 = vpop.f32.mrf.mxu0 }
  0xca   :  { %v80_v7 = vadd.f32 %v101_v5, %v79_v6 }
  0xcb   :  { %v114_v8 = vpop.f32.mrf.mxu0 }
  0xcc   :  { %86 = vst.msk [vmem:[#allocation2] sm:$0xff] %vm85_vm2, %v80_v7 }
  0xcd   :  { %v82_v9 = vpop.f32.mrf.mxu0 }
  0xce   :  { %132 = shalt.err (!%p129_p4)
}
  0xcf   :  { %96 = dma.vmem_to_hbm [thread:$0]  %s94_s21, 128, %s184_s3, [#allocation3]   ;;  %v115_v10 = vpop.f32.mrf.mxu0 }
  0xd0   :  { %141 = dma.done.wait [#allocation3], 128  }
  0xd1   :  { %142 = vsyncadd [#allocation3], 4294967168 }
  0xd2   :  { %100 = vsyncpa [#allocation3], 1 }

</bundles_post_ra>
